<compile_context>
chip_gen: v6e
topology: v6e:2x2x1
jax: 0.10.0
libtpu: 0.0.40
codegen_flags: <defaults>
</compile_context>

<pallas_src>
import jax
import jax.numpy as jnp
from jax.experimental import pallas as pl
from jax.experimental.pallas import tpu as pltpu


# --------------------------------- fused kernel -------------------------------

def make_fused_kernel(num_layers, hidden):
    """Whole DeepGraph forward in one kernel body (no grid; all VMEM-resident)."""
    H = hidden

    def kernel(x_ref, mask_ref, w0e_ref, vecs_ref, blkw_ref,
               pred_a_ref, pred_w2_ref, out_ref):
        mask = mask_ref[...]          # [N, N] additive bias (0 / -1e30), f32
        vecs = vecs_ref[...]          # [1+3L, H] packed gat0-bias / gamma / beta / bias, f32

        def gat(h, w_ext, bias):
            # Fused projection: columns [0:H) = W, col H = W@a_src^T, col H+1 = W@a_dst^T.
            xe = jnp.dot(h.astype(jnp.bfloat16), w_ext,
                         preferred_element_type=jnp.float32)      # [N, H+2] f32
            xp = xe[:, :H]                                        # projected features
            a_src = xe[:, H:H + 1]                                # [N, 1]
            a_dst = xe[:, H + 1:H + 2]                            # [N, 1]
            raw = a_dst + jnp.transpose(a_src)                    # e[i, j] = a_dst[i] + a_src[j]
            e = jnp.maximum(raw, 0.2 * raw) + mask                # LeakyReLU(0.2) + additive mask
            e = e - jnp.max(e, axis=-1, keepdims=True)            # self-loop guarantees finite max
            p = jnp.exp(e)                                        # masked entries underflow to 0
            inv = pl.reciprocal(jnp.sum(p, axis=-1, keepdims=True), approx=True)
            alpha = p * inv                                       # softmax per destination row
            return jnp.dot(alpha.astype(jnp.bfloat16), xp.astype(jnp.bfloat16),
                           preferred_element_type=jnp.float32) + bias

        def layernorm(h, gamma, beta, eps=1e-5):
            mu = jnp.mean(h, axis=-1, keepdims=True)
            var = jnp.mean((h - mu) * (h - mu), axis=-1, keepdims=True)
            return (h - mu) * jax.lax.rsqrt(var + eps) * gamma + beta

        # x = GATConv_0(x, edge_index).relu()
        x = jnp.maximum(gat(x_ref[...], w0e_ref[...], vecs[0:1, :]), 0.0)

        # DeepGCNLayer block='res+': x = x + conv(dropout(relu(norm(x))))
        for l in range(num_layers):                               # static unroll, params in VMEM
            gamma = vecs[1 + 3 * l:2 + 3 * l, :]
            beta = vecs[2 + 3 * l:3 + 3 * l, :]
            bias = vecs[3 + 3 * l:4 + 3 * l, :]
            h = jnp.maximum(layernorm(x, gamma, beta), 0.0)
            # TODO(synk): dropout(p=0.4) is identity in eval mode (no RNG drop applied).
            x = x + gat(h, blkw_ref[l], bias)

        if num_layers > 0:
            # x = residual_block[0].act(residual_block[0].norm(x))
            x = jnp.maximum(layernorm(x, vecs[1:2, :], vecs[2:3, :]), 0.0)

        # Per-node predictor MLPs, all nodes at once:
        #   h1   = relu(x @ W1_cat)            -> every predictor's hidden for every row
        #   h1m  = h1 * sel                    -> keep only the row's own node block
        #   logits = h1m @ W2_stack            -> block structure selects the right W2
        pred_a = pred_a_ref[...]                                  # [H+N, nn*H2] bf16
        w1_cat = pred_a[:H, :]
        sel = pred_a[H:, :].astype(jnp.float32)                   # 0/1 row->node block mask
        h1 = jnp.dot(x.astype(jnp.bfloat16), w1_cat,
                     preferred_element_type=jnp.float32)          # [N, nn*H2]
        h1 = jnp.maximum(h1, 0.0) * sel
        # TODO(synk): dropout(p=0.5) is identity in eval mode.
        logits = jnp.dot(h1.astype(jnp.bfloat16), pred_w2_ref[...],
                         preferred_element_type=jnp.float32)      # [N, C]
        logits = logits - jnp.max(logits, axis=-1, keepdims=True)
        p = jnp.exp(logits)
        out_ref[...] = p / jnp.sum(p, axis=-1, keepdims=True)     # exact normalization once

    return kernel


# --------------------------------- wrappers ----------------------------------

def build_bias_mask(edge_index, n, neg=-1e30):
    """Additive mask[i, j] = 0 if edge j -> i exists (edge_index[0]=src,
    [1]=dst) or i == j (GATConv add_self_loops=True), else -1e30.
    Built ONCE per graph topology and reused across forwards.
    Note: duplicate edges are deduped (torch_geometric would sum messages)."""
    src, dst = edge_index[0], edge_index[1]
    adj = jnp.zeros((n, n), jnp.float32).at[dst, src].set(1.0)
    idx = jnp.arange(n)
    adj = adj.at[idx, idx].set(1.0)
    return jnp.where(adj > 0, 0.0, neg).astype(jnp.float32)


def pack_params(params, cfg):
    """Host-side packing: fold attention vectors into W, coalesce the small
    per-layer vectors, block-concatenate the per-node predictor MLPs, and
    cast all MXU operands to bf16."""
    h = cfg["hidden_channels"]
    h2 = h // 2
    L = cfg["num_layers"]
    Ls = max(L, 1)
    nn_ = cfg["num_nodes"]
    b = cfg["batch_size"]
    n = nn_ * b
    g0 = params["gat0"]

    # gat0 projection extended with columns W@a_src^T, W@a_dst^T   -> [fin, H+2]
    w0_ext = jnp.concatenate(
        [g0["w"], g0["w"] @ g0["asrc"].T, g0["w"] @ g0["adst"].T], axis=1)

    # per-layer extended projections                               -> [Ls, H, H+2]
    blk_w_ext = jnp.concatenate(
        [params["blk_w"],
         jnp.einsum("lio,lzo->liz", params["blk_w"], params["blk_asrc"]),
         jnp.einsum("lio,lzo->liz", params["blk_w"], params["blk_adst"])], axis=2)

    # packed vectors: row 0 = gat0 bias, rows 1+3l..3+3l = gamma_l, beta_l, bias_l
    vecs = jnp.concatenate(
        [g0["bias"]]
        + [jnp.concatenate([params["blk_gamma"][l], params["blk_beta"][l],
                            params["blk_bias"][l]], axis=0) for l in range(Ls)],
        axis=0)                                                    # [1+3Ls, H]

    # predictors: W1 concat along output axis, W2 stacked along input axis,
    # plus the per-row node-block selection mask.
    w1_cat = jnp.concatenate([params["pred_w1"][i] for i in range(nn_)], axis=1)  # [H, nn*H2]
    w2_cat = jnp.reshape(params["pred_w2"], (nn_ * h2, cfg["out_channels"]))      # [nn*H2, C]
    node_of_row = jnp.repeat(jnp.arange(nn_), b)                                   # [N]
    block_of_col = jnp.arange(nn_ * h2) // h2                                      # [nn*H2]
    sel = (node_of_row[:, None] == block_of_col[None, :]).astype(jnp.float32)      # [N, nn*H2]
    pred_a = jnp.concatenate([w1_cat, sel], axis=0)                                # [H+N, nn*H2]

    return {
        "w0_ext": w0_ext.astype(jnp.bfloat16),
        "vecs": vecs.astype(jnp.float32),
        "blk_w_ext": blk_w_ext.astype(jnp.bfloat16),
        "pred_a": pred_a.astype(jnp.bfloat16),
        "pred_w2": w2_cat.astype(jnp.bfloat16),
    }


def deep_graph_forward(packed, x, bias_mask, cfg):
    nn_, b = cfg["num_nodes"], cfg["batch_size"]
    c = cfg["out_channels"]
    n = nn_ * b

    kernel = make_fused_kernel(cfg["num_layers"], cfg["hidden_channels"])
    out = pl.pallas_call(
        kernel,
        out_shape=jax.ShapeDtypeStruct((n, c), jnp.float32),
        compiler_params=pltpu.CompilerParams(vmem_limit_bytes=32 * 1024 * 1024),
    )(x, bias_mask, packed["w0_ext"], packed["vecs"], packed["blk_w_ext"],
      packed["pred_a"], packed["pred_w2"])

    # [N, C] rows are node-major, so this reshape is a free row-major view:
    # out[i] <-> torch's list_x[i] (shape [batch, C]).
    return out.reshape(nn_, b, c)


# ----------------------------- parameter setup -------------------------------

def init_params(key, cfg):
    fin = cfg["in_channels"]
    h = cfg["hidden_channels"]
    h2 = h // 2
    L = cfg["num_layers"]
    nn_ = cfg["num_nodes"]
    c = cfg["out_channels"]
    Ls = max(L, 1)     # keep a (never-read) dummy row when num_layers == 0

    keys = iter(jax.random.split(key, 16))

    def nrm(shape, scale=0.2):
        return (scale * jax.random.normal(next(keys), shape)).astype(jnp.float32)

    return {
        "gat0": {
            "w": nrm((fin, h)),
            "asrc": nrm((1, h)),
            "adst": nrm((1, h)),
            "bias": nrm((1, h), 0.05),
        },
        "blk_gamma": jnp.ones((Ls, 1, h), jnp.float32) + nrm((Ls, 1, h), 0.05),
        "blk_beta": nrm((Ls, 1, h), 0.05),
        "blk_w": nrm((Ls, h, h)),
        "blk_asrc": nrm((Ls, 1, h)),
        "blk_adst": nrm((Ls, 1, h)),
        "blk_bias": nrm((Ls, 1, h), 0.05),
        "pred_w1": nrm((nn_, h, h2)),
        "pred_w2": nrm((nn_, h2, c)),
    }


# ------------------------------------ main ------------------------------------

if __name__ == "__main__":
    config = {
        "in_channels": 4,
        "hidden_channels": 32,
        "num_layers": 2,
        "num_nodes": 8,
        "batch_size": 2,
        "out_channels": 4,
        "predict_task": "classification",
    }
    N = config["num_nodes"] * config["batch_size"]  # 16 graph nodes total

    key = jax.random.PRNGKey(0)
    k_x, k_p = jax.random.split(key)
    x = jax.random.normal(k_x, (N, config["in_channels"]), dtype=jnp.float32)

    # Deterministic synthetic graph: forward ring + skip-3 edges.
    idx = jnp.arange(N)
    src = jnp.concatenate([idx, idx])
    dst = jnp.concatenate([(idx + 1) % N, (idx + 3) % N])
    edge_index = jnp.stack([src, dst]).astype(jnp.int32)     # [2, 32]

    params = init_params(k_p, config)
    bias_mask = build_bias_mask(edge_index, N)               # built once, reused
    packed = pack_params(params, config)                      # host-side packing, once

    out = deep_graph_forward(packed, x, bias_mask, config)
    out = jax.block_until_ready(out)

    # Sanity: [num_nodes, batch_size, out_channels]; each node's softmax rows sum to 1.
    assert out.shape == (config["num_nodes"], config["batch_size"],
                         config["out_channels"])
    assert bool(jnp.all(jnp.isfinite(out)))
    assert bool(jnp.allclose(jnp.sum(out, axis=-1), 1.0, atol=1e-5))
    outs_list = [out[i] for i in range(config["num_nodes"])]  # torch-style list view
    assert len(outs_list) == config["num_nodes"]
    assert outs_list[0].shape == (config["batch_size"], config["out_channels"])

    print("KERNEL_OK")
</pallas_src>

<mosaic_0001>
module attributes {stable_mosaic.version = 11 : i64} {
  func.func @kernel(%arg0: memref<16x4xf32, #tpu.memory_space<vmem>>, %arg1: memref<16x16xf32, #tpu.memory_space<vmem>>, %arg2: memref<4x34xbf16, #tpu.memory_space<vmem>>, %arg3: memref<7x32xf32, #tpu.memory_space<vmem>>, %arg4: memref<2x32x34xbf16, #tpu.memory_space<vmem>>, %arg5: memref<48x128xbf16, #tpu.memory_space<vmem>>, %arg6: memref<128x4xbf16, #tpu.memory_space<vmem>>, %arg7: memref<16x4xf32, #tpu.memory_space<vmem>>) attributes {dimension_semantics = [], scalar_prefetch = 0 : i64, scratch_operands = 0 : i64, tpu.core_type = #tpu.core_type<tc>} {
    %c0 = arith.constant 0 : index
    %c0_0 = arith.constant 0 : index
    %0 = vector.load %arg1[%c0, %c0_0] : memref<16x16xf32, #tpu.memory_space<vmem>>, vector<16x16xf32>
    %c0_1 = arith.constant 0 : index
    %c0_2 = arith.constant 0 : index
    %1 = vector.load %arg3[%c0_1, %c0_2] : memref<7x32xf32, #tpu.memory_space<vmem>>, vector<7x32xf32>
    %c0_3 = arith.constant 0 : index
    %c0_4 = arith.constant 0 : index
    %2 = vector.load %arg0[%c0_3, %c0_4] : memref<16x4xf32, #tpu.memory_space<vmem>>, vector<16x4xf32>
    %c0_5 = arith.constant 0 : index
    %c0_6 = arith.constant 0 : index
    %3 = vector.load %arg2[%c0_5, %c0_6] : memref<4x34xbf16, #tpu.memory_space<vmem>>, vector<4x34xbf16>
    %4 = vector.extract_strided_slice %1 {offsets = [0, 0], sizes = [1, 32], strides = [1, 1]} : vector<7x32xf32> to vector<1x32xf32>
    %5 = arith.truncf %2 : vector<16x4xf32> to vector<16x4xbf16>
    %cst = arith.constant dense<0.000000e+00> : vector<16x34xf32>
    %6 = tpu.matmul %5, %3, %cst {dimension_numbers = #tpu.dot_dimension_numbers<[1], [0], [0], [1], [0, 0, 1, 1], [], []>} : vector<16x4xbf16>, vector<4x34xbf16>, vector<16x34xf32> -> vector<16x34xf32>
    %7 = vector.extract_strided_slice %6 {offsets = [0, 0], sizes = [16, 32], strides = [1, 1]} : vector<16x34xf32> to vector<16x32xf32>
    %8 = vector.extract_strided_slice %6 {offsets = [0, 32], sizes = [16, 1], strides = [1, 1]} : vector<16x34xf32> to vector<16x1xf32>
    %9 = vector.extract_strided_slice %6 {offsets = [0, 33], sizes = [16, 1], strides = [1, 1]} : vector<16x34xf32> to vector<16x1xf32>
    %10 = tpu.transpose %8, [1, 0] : vector<16x1xf32> -> vector<1x16xf32>
    %11 = vector.broadcast %9 : vector<16x1xf32> to vector<16x16xf32>
    %12 = vector.broadcast %10 : vector<1x16xf32> to vector<16x16xf32>
    %13 = arith.addf %11, %12 : vector<16x16xf32>
    %cst_7 = arith.constant 2.000000e-01 : f32
    %14 = vector.broadcast %cst_7 : f32 to vector<16x16xf32>
    %15 = arith.mulf %14, %13 : vector<16x16xf32>
    %16 = arith.maximumf %13, %15 : vector<16x16xf32>
    %17 = arith.addf %16, %0 : vector<16x16xf32>
    %cst_8 = arith.constant dense<0xFF800000> : vector<16xf32>
    %18 = vector.multi_reduction <maximumf>, %17, %cst_8 [1] : vector<16x16xf32> to vector<16xf32>
    %19 = vector.shape_cast %18 : vector<16xf32> to vector<16x1xf32>
    %20 = vector.broadcast %19 : vector<16x1xf32> to vector<16x16xf32>
    %21 = arith.subf %17, %20 : vector<16x16xf32>
    %22 = math.exp %21 : vector<16x16xf32>
    %cst_9 = arith.constant dense<0.000000e+00> : vector<16xf32>
    %23 = vector.multi_reduction <add>, %22, %cst_9 [1] : vector<16x16xf32> to vector<16xf32>
    %24 = vector.shape_cast %23 : vector<16xf32> to vector<16x1xf32>
    %25 = tpu.reciprocal %24 {approx = true} : vector<16x1xf32> -> vector<16x1xf32>
    %26 = vector.broadcast %25 : vector<16x1xf32> to vector<16x16xf32>
    %27 = arith.mulf %22, %26 : vector<16x16xf32>
    %28 = arith.truncf %27 : vector<16x16xf32> to vector<16x16xbf16>
    %29 = arith.truncf %7 : vector<16x32xf32> to vector<16x32xbf16>
    %cst_10 = arith.constant dense<0.000000e+00> : vector<16x32xf32>
    %30 = tpu.matmul %28, %29, %cst_10 {dimension_numbers = #tpu.dot_dimension_numbers<[1], [0], [0], [1], [0, 0, 1, 1], [], []>} : vector<16x16xbf16>, vector<16x32xbf16>, vector<16x32xf32> -> vector<16x32xf32>
    %31 = vector.broadcast %4 : vector<1x32xf32> to vector<16x32xf32>
    %32 = arith.addf %30, %31 : vector<16x32xf32>
    %cst_11 = arith.constant 0.000000e+00 : f32
    %33 = vector.broadcast %cst_11 : f32 to vector<16x32xf32>
    %34 = arith.maximumf %32, %33 : vector<16x32xf32>
    %35 = vector.extract_strided_slice %1 {offsets = [1, 0], sizes = [1, 32], strides = [1, 1]} : vector<7x32xf32> to vector<1x32xf32>
    %36 = vector.extract_strided_slice %1 {offsets = [2, 0], sizes = [1, 32], strides = [1, 1]} : vector<7x32xf32> to vector<1x32xf32>
    %37 = vector.extract_strided_slice %1 {offsets = [3, 0], sizes = [1, 32], strides = [1, 1]} : vector<7x32xf32> to vector<1x32xf32>
    %cst_12 = arith.constant dense<0.000000e+00> : vector<16xf32>
    %38 = vector.multi_reduction <add>, %34, %cst_12 [1] : vector<16x32xf32> to vector<16xf32>
    %39 = vector.shape_cast %38 : vector<16xf32> to vector<16x1xf32>
    %cst_13 = arith.constant 3.200000e+01 : f32
    %40 = vector.broadcast %cst_13 : f32 to vector<16x1xf32>
    %41 = arith.divf %39, %40 : vector<16x1xf32>
    %42 = vector.broadcast %41 : vector<16x1xf32> to vector<16x32xf32>
    %43 = arith.subf %34, %42 : vector<16x32xf32>
    %44 = vector.broadcast %41 : vector<16x1xf32> to vector<16x32xf32>
    %45 = arith.subf %34, %44 : vector<16x32xf32>
    %46 = arith.mulf %43, %45 : vector<16x32xf32>
    %cst_14 = arith.constant dense<0.000000e+00> : vector<16xf32>
    %47 = vector.multi_reduction <add>, %46, %cst_14 [1] : vector<16x32xf32> to vector<16xf32>
    %48 = vector.shape_cast %47 : vector<16xf32> to vector<16x1xf32>
    %cst_15 = arith.constant 3.200000e+01 : f32
    %49 = vector.broadcast %cst_15 : f32 to vector<16x1xf32>
    %50 = arith.divf %48, %49 : vector<16x1xf32>
    %51 = vector.broadcast %41 : vector<16x1xf32> to vector<16x32xf32>
    %52 = arith.subf %34, %51 : vector<16x32xf32>
    %cst_16 = arith.constant 9.99999974E-6 : f32
    %53 = vector.broadcast %cst_16 : f32 to vector<16x1xf32>
    %54 = arith.addf %50, %53 : vector<16x1xf32>
    %55 = math.rsqrt %54 : vector<16x1xf32>
    %56 = vector.broadcast %55 : vector<16x1xf32> to vector<16x32xf32>
    %57 = arith.mulf %52, %56 : vector<16x32xf32>
    %58 = vector.broadcast %35 : vector<1x32xf32> to vector<16x32xf32>
    %59 = arith.mulf %57, %58 : vector<16x32xf32>
    %60 = vector.broadcast %36 : vector<1x32xf32> to vector<16x32xf32>
    %61 = arith.addf %59, %60 : vector<16x32xf32>
    %cst_17 = arith.constant 0.000000e+00 : f32
    %62 = vector.broadcast %cst_17 : f32 to vector<16x32xf32>
    %63 = arith.maximumf %61, %62 : vector<16x32xf32>
    %c0_18 = arith.constant 0 : index
    %c0_19 = arith.constant 0 : index
    %c0_20 = arith.constant 0 : index
    %64 = vector.load %arg4[%c0_18, %c0_19, %c0_20] : memref<2x32x34xbf16, #tpu.memory_space<vmem>>, vector<1x32x34xbf16>
    %65 = vector.shape_cast %64 : vector<1x32x34xbf16> to vector<32x34xbf16>
    %66 = arith.truncf %63 : vector<16x32xf32> to vector<16x32xbf16>
    %cst_21 = arith.constant dense<0.000000e+00> : vector<16x34xf32>
    %67 = tpu.matmul %66, %65, %cst_21 {dimension_numbers = #tpu.dot_dimension_numbers<[1], [0], [0], [1], [0, 0, 1, 1], [], []>} : vector<16x32xbf16>, vector<32x34xbf16>, vector<16x34xf32> -> vector<16x34xf32>
    %68 = vector.extract_strided_slice %67 {offsets = [0, 0], sizes = [16, 32], strides = [1, 1]} : vector<16x34xf32> to vector<16x32xf32>
    %69 = vector.extract_strided_slice %67 {offsets = [0, 32], sizes = [16, 1], strides = [1, 1]} : vector<16x34xf32> to vector<16x1xf32>
    %70 = vector.extract_strided_slice %67 {offsets = [0, 33], sizes = [16, 1], strides = [1, 1]} : vector<16x34xf32> to vector<16x1xf32>
    %71 = tpu.transpose %69, [1, 0] : vector<16x1xf32> -> vector<1x16xf32>
    %72 = vector.broadcast %70 : vector<16x1xf32> to vector<16x16xf32>
    %73 = vector.broadcast %71 : vector<1x16xf32> to vector<16x16xf32>
    %74 = arith.addf %72, %73 : vector<16x16xf32>
    %cst_22 = arith.constant 2.000000e-01 : f32
    %75 = vector.broadcast %cst_22 : f32 to vector<16x16xf32>
    %76 = arith.mulf %75, %74 : vector<16x16xf32>
    %77 = arith.maximumf %74, %76 : vector<16x16xf32>
    %78 = arith.addf %77, %0 : vector<16x16xf32>
    %cst_23 = arith.constant dense<0xFF800000> : vector<16xf32>
    %79 = vector.multi_reduction <maximumf>, %78, %cst_23 [1] : vector<16x16xf32> to vector<16xf32>
    %80 = vector.shape_cast %79 : vector<16xf32> to vector<16x1xf32>
    %81 = vector.broadcast %80 : vector<16x1xf32> to vector<16x16xf32>
    %82 = arith.subf %78, %81 : vector<16x16xf32>
    %83 = math.exp %82 : vector<16x16xf32>
    %cst_24 = arith.constant dense<0.000000e+00> : vector<16xf32>
    %84 = vector.multi_reduction <add>, %83, %cst_24 [1] : vector<16x16xf32> to vector<16xf32>
    %85 = vector.shape_cast %84 : vector<16xf32> to vector<16x1xf32>
    %86 = tpu.reciprocal %85 {approx = true} : vector<16x1xf32> -> vector<16x1xf32>
    %87 = vector.broadcast %86 : vector<16x1xf32> to vector<16x16xf32>
    %88 = arith.mulf %83, %87 : vector<16x16xf32>
    %89 = arith.truncf %88 : vector<16x16xf32> to vector<16x16xbf16>
    %90 = arith.truncf %68 : vector<16x32xf32> to vector<16x32xbf16>
    %cst_25 = arith.constant dense<0.000000e+00> : vector<16x32xf32>
    %91 = tpu.matmul %89, %90, %cst_25 {dimension_numbers = #tpu.dot_dimension_numbers<[1], [0], [0], [1], [0, 0, 1, 1], [], []>} : vector<16x16xbf16>, vector<16x32xbf16>, vector<16x32xf32> -> vector<16x32xf32>
    %92 = vector.broadcast %37 : vector<1x32xf32> to vector<16x32xf32>
    %93 = arith.addf %91, %92 : vector<16x32xf32>
    %94 = arith.addf %34, %93 : vector<16x32xf32>
    %95 = vector.extract_strided_slice %1 {offsets = [4, 0], sizes = [1, 32], strides = [1, 1]} : vector<7x32xf32> to vector<1x32xf32>
    %96 = vector.extract_strided_slice %1 {offsets = [5, 0], sizes = [1, 32], strides = [1, 1]} : vector<7x32xf32> to vector<1x32xf32>
    %97 = vector.extract_strided_slice %1 {offsets = [6, 0], sizes = [1, 32], strides = [1, 1]} : vector<7x32xf32> to vector<1x32xf32>
    %cst_26 = arith.constant dense<0.000000e+00> : vector<16xf32>
    %98 = vector.multi_reduction <add>, %94, %cst_26 [1] : vector<16x32xf32> to vector<16xf32>
    %99 = vector.shape_cast %98 : vector<16xf32> to vector<16x1xf32>
    %cst_27 = arith.constant 3.200000e+01 : f32
    %100 = vector.broadcast %cst_27 : f32 to vector<16x1xf32>
    %101 = arith.divf %99, %100 : vector<16x1xf32>
    %102 = vector.broadcast %101 : vector<16x1xf32> to vector<16x32xf32>
    %103 = arith.subf %94, %102 : vector<16x32xf32>
    %104 = vector.broadcast %101 : vector<16x1xf32> to vector<16x32xf32>
    %105 = arith.subf %94, %104 : vector<16x32xf32>
    %106 = arith.mulf %103, %105 : vector<16x32xf32>
    %cst_28 = arith.constant dense<0.000000e+00> : vector<16xf32>
    %107 = vector.multi_reduction <add>, %106, %cst_28 [1] : vector<16x32xf32> to vector<16xf32>
    %108 = vector.shape_cast %107 : vector<16xf32> to vector<16x1xf32>
    %cst_29 = arith.constant 3.200000e+01 : f32
    %109 = vector.broadcast %cst_29 : f32 to vector<16x1xf32>
    %110 = arith.divf %108, %109 : vector<16x1xf32>
    %111 = vector.broadcast %101 : vector<16x1xf32> to vector<16x32xf32>
    %112 = arith.subf %94, %111 : vector<16x32xf32>
    %cst_30 = arith.constant 9.99999974E-6 : f32
    %113 = vector.broadcast %cst_30 : f32 to vector<16x1xf32>
    %114 = arith.addf %110, %113 : vector<16x1xf32>
    %115 = math.rsqrt %114 : vector<16x1xf32>
    %116 = vector.broadcast %115 : vector<16x1xf32> to vector<16x32xf32>
    %117 = arith.mulf %112, %116 : vector<16x32xf32>
    %118 = vector.broadcast %95 : vector<1x32xf32> to vector<16x32xf32>
    %119 = arith.mulf %117, %118 : vector<16x32xf32>
    %120 = vector.broadcast %96 : vector<1x32xf32> to vector<16x32xf32>
    %121 = arith.addf %119, %120 : vector<16x32xf32>
    %cst_31 = arith.constant 0.000000e+00 : f32
    %122 = vector.broadcast %cst_31 : f32 to vector<16x32xf32>
    %123 = arith.maximumf %121, %122 : vector<16x32xf32>
    %c1 = arith.constant 1 : index
    %c0_32 = arith.constant 0 : index
    %c0_33 = arith.constant 0 : index
    %124 = vector.load %arg4[%c1, %c0_32, %c0_33] : memref<2x32x34xbf16, #tpu.memory_space<vmem>>, vector<1x32x34xbf16>
    %125 = vector.shape_cast %124 : vector<1x32x34xbf16> to vector<32x34xbf16>
    %126 = arith.truncf %123 : vector<16x32xf32> to vector<16x32xbf16>
    %cst_34 = arith.constant dense<0.000000e+00> : vector<16x34xf32>
    %127 = tpu.matmul %126, %125, %cst_34 {dimension_numbers = #tpu.dot_dimension_numbers<[1], [0], [0], [1], [0, 0, 1, 1], [], []>} : vector<16x32xbf16>, vector<32x34xbf16>, vector<16x34xf32> -> vector<16x34xf32>
    %128 = vector.extract_strided_slice %127 {offsets = [0, 0], sizes = [16, 32], strides = [1, 1]} : vector<16x34xf32> to vector<16x32xf32>
    %129 = vector.extract_strided_slice %127 {offsets = [0, 32], sizes = [16, 1], strides = [1, 1]} : vector<16x34xf32> to vector<16x1xf32>
    %130 = vector.extract_strided_slice %127 {offsets = [0, 33], sizes = [16, 1], strides = [1, 1]} : vector<16x34xf32> to vector<16x1xf32>
    %131 = tpu.transpose %129, [1, 0] : vector<16x1xf32> -> vector<1x16xf32>
    %132 = vector.broadcast %130 : vector<16x1xf32> to vector<16x16xf32>
    %133 = vector.broadcast %131 : vector<1x16xf32> to vector<16x16xf32>
    %134 = arith.addf %132, %133 : vector<16x16xf32>
    %cst_35 = arith.constant 2.000000e-01 : f32
    %135 = vector.broadcast %cst_35 : f32 to vector<16x16xf32>
    %136 = arith.mulf %135, %134 : vector<16x16xf32>
    %137 = arith.maximumf %134, %136 : vector<16x16xf32>
    %138 = arith.addf %137, %0 : vector<16x16xf32>
    %cst_36 = arith.constant dense<0xFF800000> : vector<16xf32>
    %139 = vector.multi_reduction <maximumf>, %138, %cst_36 [1] : vector<16x16xf32> to vector<16xf32>
    %140 = vector.shape_cast %139 : vector<16xf32> to vector<16x1xf32>
    %141 = vector.broadcast %140 : vector<16x1xf32> to vector<16x16xf32>
    %142 = arith.subf %138, %141 : vector<16x16xf32>
    %143 = math.exp %142 : vector<16x16xf32>
    %cst_37 = arith.constant dense<0.000000e+00> : vector<16xf32>
    %144 = vector.multi_reduction <add>, %143, %cst_37 [1] : vector<16x16xf32> to vector<16xf32>
    %145 = vector.shape_cast %144 : vector<16xf32> to vector<16x1xf32>
    %146 = tpu.reciprocal %145 {approx = true} : vector<16x1xf32> -> vector<16x1xf32>
    %147 = vector.broadcast %146 : vector<16x1xf32> to vector<16x16xf32>
    %148 = arith.mulf %143, %147 : vector<16x16xf32>
    %149 = arith.truncf %148 : vector<16x16xf32> to vector<16x16xbf16>
    %150 = arith.truncf %128 : vector<16x32xf32> to vector<16x32xbf16>
    %cst_38 = arith.constant dense<0.000000e+00> : vector<16x32xf32>
    %151 = tpu.matmul %149, %150, %cst_38 {dimension_numbers = #tpu.dot_dimension_numbers<[1], [0], [0], [1], [0, 0, 1, 1], [], []>} : vector<16x16xbf16>, vector<16x32xbf16>, vector<16x32xf32> -> vector<16x32xf32>
    %152 = vector.broadcast %97 : vector<1x32xf32> to vector<16x32xf32>
    %153 = arith.addf %151, %152 : vector<16x32xf32>
    %154 = arith.addf %94, %153 : vector<16x32xf32>
    %155 = vector.extract_strided_slice %1 {offsets = [1, 0], sizes = [1, 32], strides = [1, 1]} : vector<7x32xf32> to vector<1x32xf32>
    %156 = vector.extract_strided_slice %1 {offsets = [2, 0], sizes = [1, 32], strides = [1, 1]} : vector<7x32xf32> to vector<1x32xf32>
    %cst_39 = arith.constant dense<0.000000e+00> : vector<16xf32>
    %157 = vector.multi_reduction <add>, %154, %cst_39 [1] : vector<16x32xf32> to vector<16xf32>
    %158 = vector.shape_cast %157 : vector<16xf32> to vector<16x1xf32>
    %cst_40 = arith.constant 3.200000e+01 : f32
    %159 = vector.broadcast %cst_40 : f32 to vector<16x1xf32>
    %160 = arith.divf %158, %159 : vector<16x1xf32>
    %161 = vector.broadcast %160 : vector<16x1xf32> to vector<16x32xf32>
    %162 = arith.subf %154, %161 : vector<16x32xf32>
    %163 = vector.broadcast %160 : vector<16x1xf32> to vector<16x32xf32>
    %164 = arith.subf %154, %163 : vector<16x32xf32>
    %165 = arith.mulf %162, %164 : vector<16x32xf32>
    %cst_41 = arith.constant dense<0.000000e+00> : vector<16xf32>
    %166 = vector.multi_reduction <add>, %165, %cst_41 [1] : vector<16x32xf32> to vector<16xf32>
    %167 = vector.shape_cast %166 : vector<16xf32> to vector<16x1xf32>
    %cst_42 = arith.constant 3.200000e+01 : f32
    %168 = vector.broadcast %cst_42 : f32 to vector<16x1xf32>
    %169 = arith.divf %167, %168 : vector<16x1xf32>
    %170 = vector.broadcast %160 : vector<16x1xf32> to vector<16x32xf32>
    %171 = arith.subf %154, %170 : vector<16x32xf32>
    %cst_43 = arith.constant 9.99999974E-6 : f32
    %172 = vector.broadcast %cst_43 : f32 to vector<16x1xf32>
    %173 = arith.addf %169, %172 : vector<16x1xf32>
    %174 = math.rsqrt %173 : vector<16x1xf32>
    %175 = vector.broadcast %174 : vector<16x1xf32> to vector<16x32xf32>
    %176 = arith.mulf %171, %175 : vector<16x32xf32>
    %177 = vector.broadcast %155 : vector<1x32xf32> to vector<16x32xf32>
    %178 = arith.mulf %176, %177 : vector<16x32xf32>
    %179 = vector.broadcast %156 : vector<1x32xf32> to vector<16x32xf32>
    %180 = arith.addf %178, %179 : vector<16x32xf32>
    %cst_44 = arith.constant 0.000000e+00 : f32
    %181 = vector.broadcast %cst_44 : f32 to vector<16x32xf32>
    %182 = arith.maximumf %180, %181 : vector<16x32xf32>
    %c0_45 = arith.constant 0 : index
    %c0_46 = arith.constant 0 : index
    %183 = vector.load %arg5[%c0_45, %c0_46] : memref<48x128xbf16, #tpu.memory_space<vmem>>, vector<48x128xbf16>
    %184 = vector.extract_strided_slice %183 {offsets = [0, 0], sizes = [32, 128], strides = [1, 1]} : vector<48x128xbf16> to vector<32x128xbf16>
    %185 = vector.extract_strided_slice %183 {offsets = [32, 0], sizes = [16, 128], strides = [1, 1]} : vector<48x128xbf16> to vector<16x128xbf16>
    %186 = arith.extf %185 : vector<16x128xbf16> to vector<16x128xf32>
    %187 = arith.truncf %182 : vector<16x32xf32> to vector<16x32xbf16>
    %cst_47 = arith.constant dense<0.000000e+00> : vector<16x128xf32>
    %188 = tpu.matmul %187, %184, %cst_47 {dimension_numbers = #tpu.dot_dimension_numbers<[1], [0], [0], [1], [0, 0, 1, 1], [], []>} : vector<16x32xbf16>, vector<32x128xbf16>, vector<16x128xf32> -> vector<16x128xf32>
    %cst_48 = arith.constant 0.000000e+00 : f32
    %189 = vector.broadcast %cst_48 : f32 to vector<16x128xf32>
    %190 = arith.maximumf %188, %189 : vector<16x128xf32>
    %191 = arith.mulf %190, %186 : vector<16x128xf32>
    %192 = arith.truncf %191 : vector<16x128xf32> to vector<16x128xbf16>
    %c0_49 = arith.constant 0 : index
    %c0_50 = arith.constant 0 : index
    %193 = vector.load %arg6[%c0_49, %c0_50] : memref<128x4xbf16, #tpu.memory_space<vmem>>, vector<128x4xbf16>
    %cst_51 = arith.constant dense<0.000000e+00> : vector<16x4xf32>
    %194 = tpu.matmul %192, %193, %cst_51 {dimension_numbers = #tpu.dot_dimension_numbers<[1], [0], [0], [1], [0, 0, 1, 1], [], []>} : vector<16x128xbf16>, vector<128x4xbf16>, vector<16x4xf32> -> vector<16x4xf32>
    %cst_52 = arith.constant dense<0xFF800000> : vector<16xf32>
    %195 = vector.multi_reduction <maximumf>, %194, %cst_52 [1] : vector<16x4xf32> to vector<16xf32>
    %196 = vector.shape_cast %195 : vector<16xf32> to vector<16x1xf32>
    %197 = vector.broadcast %196 : vector<16x1xf32> to vector<16x4xf32>
    %198 = arith.subf %194, %197 : vector<16x4xf32>
    %199 = math.exp %198 : vector<16x4xf32>
    %cst_53 = arith.constant dense<0.000000e+00> : vector<16xf32>
    %200 = vector.multi_reduction <add>, %199, %cst_53 [1] : vector<16x4xf32> to vector<16xf32>
    %201 = vector.shape_cast %200 : vector<16xf32> to vector<16x1xf32>
    %202 = vector.broadcast %201 : vector<16x1xf32> to vector<16x4xf32>
    %203 = arith.divf %199, %202 : vector<16x4xf32>
    %c0_54 = arith.constant 0 : index
    %c0_55 = arith.constant 0 : index
    %204 = vector.load %arg7[%c0_54, %c0_55] : memref<16x4xf32, #tpu.memory_space<vmem>>, vector<16x4xf32>
    tpu.vector_store %arg7[%c0_54, %c0_55], %203 {strides = array<i32>} : memref<16x4xf32, #tpu.memory_space<vmem>>, vector<16x4xf32>,
    return
  }
}

</mosaic_0001>

<bundles_post_ra>
// kernel: tpu_custom_call.1
= control target key start
LH: loop header
LB: loop body
LE: loop exit
PB: predicated region body
PF: predicated region fallthrough
CT: control target
= control target key end

     0   :  { %vm38_vm0 = vcmask 1041408   ;;  %v1114_v0 = vmov 0.0   ;;  %vm1115_vm1 = vmmov 0   ;;  %v1116_v6 = vmov 33   ;;  %s1370_s2 = inlined_call_operand.vmem [shape: bf16[4,34], index: 2, kind: input, shape index: {}]   ;;  %s1371_s0 = inlined_call_operand.vmem [shape: f32[16,4], index: 0, kind: input, shape index: {}]   ;;  %s1372_s1 = inlined_call_operand.vmem [shape: f32[16,16], index: 1, kind: input, shape index: {}]   ;;  %s1373_s3 = inlined_call_operand.vmem [shape: f32[7,32], index: 3, kind: input, shape index: {}]   ;;  %s1374_s4 = inlined_call_operand.vmem [shape: bf16[2,32,34], index: 4, kind: input, shape index: {}]   ;;  %s1375_s5 = inlined_call_operand.vmem [shape: bf16[48,128], index: 5, kind: input, shape index: {}]   ;;  %s1376_s6 = inlined_call_operand.vmem [shape: bf16[128,4], index: 6, kind: input, shape index: {}]   ;;  %s1377_s7 = inlined_call_operand.vmem [shape: f32[16,4], index: 7, kind: output, shape index: {}]  }
   0x1   :  { %982 = vmatprep.subr.bf16.mxu0 %v1114_v0  ;;  %v32_v1 = vld [vmem:[%s1370_s2] sm:$0x3]  ;;  %984 = vmatprep.mubr.msk.bf16.mxu0 %vm1115_vm1, %v1114_v0  ;;  %v31_v3 = vld [vmem:[%s1371_s0 + $0x8] sm:$0xff]  ;;  %vm34_vm2 = vcmask 31744   ;;  %v131_v14 = vlaneseq  ;;  %vm143_vm3 = vcmask 130048   ;;  %vm218_vm4 = vcmask 261120  }
   0x2   :  { %v30_v2 = vld [vmem:[%s1371_s0] sm:$0xff]  ;;  %v40_v4 = vsel %vm38_vm0, %v32_v1, 0  ;;  %1054 = vset.pattern.permute.xlu1 %v1116_v6  ;;  %1002 = vmatprep.subr.bf16.mxu1 %v1114_v0  ;;  %s1117_s0 = smov 96   ;;  %v1189_v25 = vld [vmem:[%s1372_s1 + $0x8] sm:$0xff] }
   0x3   :  { %v33_v5 = vpack.c.bf16 %v31_v3, %v30_v2  ;;  %983 = vmatpush3.bf16.msra.mxu0 %v40_v4  ;;  %1004 = vmatprep.mubr.msk.bf16.mxu1 %vm1115_vm1, %v1114_v0  ;;  %v1180_v15 = vshrl.u32 %v131_v14, 7  ;;  %v1194_v26 = vld [vmem:[%s1372_s1] sm:$0xff] }
   0x4   :  { %988 = vmatprep.subr.bf16.mxu0 %v1114_v0  ;;  %v1208_v50 = vld [vmem:[%s1373_s3] sm:$0x7f] }
   0x5   :  { %v1183_v17 = vsub.s32 0, %v1180_v15 }
   0x6   :  { %985 = vmatmul.mubr.msk.bf16.vlgmr.msra.gmra.mxu0 %vm34_vm2, %v33_v5 }
   0x7   :  { %990 = vmatprep.mubr.msk.bf16.mxu0 %vm1115_vm1, %v1114_v0  ;;  %v171_v51 = vrot.slane %v1208_v50, %v1183_v17 }
  0xc6   :  { %v76_v7 = vpop.f32.mrf.mxu0 }
  0xc7   :  { %124 = vperm.xlu1 %1054, %v76_v7   ;;  %85 = vrot.lane.b32.xlu0 %v76_v7, %s1117_s0 }
  0xc8   :  { %v986_v8 = vpop.f32.mrf.mxu0 }
  0xca   :  { %v79_v9 = vpop.f32.mrf.mxu0 }
  0xcb   :  { %v167_v10 = vpack.c.bf16 %v79_v9, %v76_v7  ;;  %128 = vperm.xlu1 %1054, %v79_v9   ;;  %87 = vrot.lane.b32.xlu0 %v79_v9, %s1117_s0  ;;  %v1056_v9 = vld [vmem:[%s1374_s4 + $0x8] sm:$0xff]  }
  0xcc   :  { %v987_v11 = vpop.f32.mrf.mxu0 }
  0xcd   :  { %989 = vmatpush3.bf16.msra.mxu0 %v167_v10  ;;  %v1057_v10 = vld [vmem:[%s1374_s4] sm:$0xff]  }
  0xce   :  { %994 = vmatprep.subr.bf16.mxu0 %v1114_v0 }
 0x139   :  { %v86_v12 = vpop.permute.xlu0 %85 }
 0x13a   :  { %91 = vxpose.xlu0.b32.start [1/2] (short) (narrow) %v86_v12, 8 }
 0x13d   :  { %v88_v13 = vpop.permute.xlu0 %87 }
 0x13e   :  { %92 = vxpose.xlu0.b32.end [2/2] (short) (narrow) %v88_v13, 8 }
 0x142   :  { %v125_v16 = vpop.permute.xlu1 %124 }
 0x146   :  { %v129_v20 = vpop.permute.xlu1 %128 }
 0x167   :  { %1055 = vset.pattern.permute.xlu0 %v1116_v6 }
 0x1b6   :  { %v107_v18 = vpop.trf.xlu0 }
 0x1b7   :  { %v134_v19 = vrot.slane %v107_v18, %v1183_v17 }
 0x1b9   :  { %v135_v21 = vadd.f32 %v134_v19, %v125_v16  ;;  %v136_v22 = vadd.f32 %v134_v19, %v129_v20  ;;  %v248_v19 = vsub.s32 1, %v1180_v15 }
 0x1bb   :  { %v137_v23 = vmul.f32 0.2, %v135_v21  ;;  %v138_v24 = vmul.f32 0.2, %v136_v22  ;;  %v1234_v20 = vrot.slane %v1208_v50, %v248_v19 }
 0x1bd   :  { %v140_v27 = vmax.f32 %v136_v22, %v138_v24  ;;  %v139_v28 = vmax.f32 %v135_v21, %v137_v23  ;;  %v254_v21 = vsub.s32 2, %v1180_v15 }
 0x1bf   :  { %v142_v29 = vadd.f32 %v140_v27, %v1189_v25  ;;  %v141_v30 = vadd.f32 %v139_v28, %v1194_v26  ;;  %v1239_v27 = vrot.slane %v1208_v50, %v254_v21 }
 0x1c1   :  { %v147_v31 = vsel %vm143_vm3, %v142_v29, -inf  ;;  %v144_v32 = vsel %vm143_vm3, %v141_v30, -inf }
 0x1c2   :  { %148 = vmax.xlane.f32.xlu0 %v147_v31  ;;  %145 = vmax.xlane.f32.xlu1 %v144_v32 }
 0x24b   :  { %v149_v33 = vpop.xlane.xlu0 %148  ;;  %v146_v34 = vpop.xlane.xlu1 %145 }
 0x24c   :  { %v151_v35 = vsub.f32 %v142_v29, %v149_v33  ;;  %v150_v36 = vsub.f32 %v141_v30, %v146_v34 }
 0x24e   :  { %v152_v37 = vmul.f32 1.442695, %v150_v36  ;;  %v154_v38 = vmul.f32 1.442695, %v151_v35 }
 0x250   :  { %1070 = vpow2.f32 %v152_v37 }
 0x251   :  { %1072 = vpow2.f32 %v154_v38 }
 0x25d   :  { %v1071_v39 = vpop.eup %1070 }
 0x25e   :  { %v156_v40 = vsel %vm143_vm3, %v1071_v39, 0.0  ;;  %v1073_v41 = vpop.eup %1072 }
 0x25f   :  { %157 = vadd.xlane.f32.xlu1 %v156_v40  ;;  %v159_v42 = vsel %vm143_vm3, %v1073_v41, 0.0 }
 0x263   :  { %160 = vadd.xlane.f32.xlu1 %v159_v42 }
 0x2e8   :  { %v158_v43 = vpop.xlane.xlu1 %157 }
 0x2e9   :  { %1074 = vrcp.f32 %v158_v43 }
 0x2ec   :  { %v161_v44 = vpop.xlane.xlu1 %160 }
 0x2ed   :  { %1076 = vrcp.f32 %v161_v44 }
 0x2f6   :  { %v1075_v45 = vpop.eup %1074 }
 0x2f7   :  { %v164_v47 = vmul.f32 %v1075_v45, %v1071_v39 }
 0x2fa   :  { %v1077_v46 = vpop.eup %1076 }
 0x2fb   :  { %v165_v48 = vmul.f32 %v1077_v46, %v1073_v41 }
 0x2fd   :  { %v166_v49 = vpack.c.bf16 %v165_v48, %v164_v47 }
 0x2ff   :  { %991 = vmatmul.mubr.msk.bf16.vlgmr.msra.gmra.mxu0 %vm143_vm3, %v166_v49 }
 0x300   :  { %998 = vmatprep.mubr.msk.bf16.mxu0 %vm1115_vm1, %v1114_v0  ;;  %995 = vmatpush3.bf16.msra.mxu0 %v1056_v9 }
 0x301   :  { %996 = vmatprep.subr.bf16.mxu0 %v1114_v0 }
 0x304   :  { %997 = vmatpush3.bf16.msra.mxu0 %v1057_v10 }
 0x305   :  { %1008 = vmatprep.subr.bf16.mxu0 %v1114_v0 }
 0x3bf   :  { %v209_v52 = vpop.f32.mrf.mxu0 }
 0x3c0   :  { %v210_v53 = vadd.f32 %v209_v52, %v171_v51 }
 0x3c1   :  { %v992_v54 = vpop.f32.mrf.mxu0 }
 0x3c2   :  { %v1212_v55 = vmax.f32 %v210_v53, 0.0 }
 0x3c3   :  { %v212_v56 = vpop.f32.mrf.mxu0 }
 0x3c4   :  { %v213_v57 = vadd.f32 %v212_v56, %v171_v51  ;;  %v219_v58 = vsel %vm218_vm4, %v1212_v55, 0.0 }
 0x3c5   :  { %220 = vadd.xlane.f32.xlu1 %v219_v58  ;;  %v993_v59 = vpop.f32.mrf.mxu0 }
 0x3c6   :  { %v1216_v60 = vmax.f32 %v213_v57, 0.0 }
 0x3c8   :  { %v222_v61 = vsel %vm218_vm4, %v1216_v60, 0.0 }
 0x3c9   :  { %223 = vadd.xlane.f32.xlu1 %v222_v61 }
 0x44e   :  { %v221_v62 = vpop.xlane.xlu1 %220 }
 0x44f   :  { %v226_v63 = vmul.f32 0.03125, %v221_v62 }
 0x451   :  { %v228_v1 = vsub.f32 %v1212_v55, %v226_v63 }
 0x452   :  { %v224_v2 = vpop.xlane.xlu1 %223 }
 0x453   :  { %v227_v3 = vmul.f32 0.03125, %v224_v2  ;;  %v230_v4 = vmul.f32 %v228_v1, %v228_v1 }
 0x455   :  { %v229_v5 = vsub.f32 %v1216_v60, %v227_v3  ;;  %v232_v6 = vsel %vm218_vm4, %v230_v4, 0.0 }
 0x456   :  { %233 = vadd.xlane.f32.xlu1 %v232_v6 }
 0x457   :  { %v231_v7 = vmul.f32 %v229_v5, %v229_v5 }
 0x459   :  { %v235_v8 = vsel %vm218_vm4, %v231_v7, 0.0 }
 0x45a   :  { %236 = vadd.xlane.f32.xlu1 %v235_v8 }
 0x4df   :  { %v234_v11 = vpop.xlane.xlu1 %233 }
 0x4e0   :  { %v238_v12 = vmul.f32 0.03125, %v234_v11 }
 0x4e2   :  { %v240_v13 = vadd.f32 1e-05, %v238_v12 }
 0x4e3   :  { %v237_v14 = vpop.xlane.xlu1 %236 }
 0x4e4   :  { %1078 = vrsqrt.f32 %v240_v13  ;;  %v239_v16 = vmul.f32 0.03125, %v237_v14  ;;  %v407_v14 = vsub.s32 3, %v1180_v15 }
 0x4e6   :  { %v241_v18 = vadd.f32 1e-05, %v239_v16  ;;  %v408_v16 = vrot.slane %v1208_v50, %v407_v14 }
 0x4e8   :  { %1080 = vrsqrt.f32 %v241_v18 }
 0x4f1   :  { %v1079_v22 = vpop.eup %1078 }
 0x4f2   :  { %v244_v23 = vmul.f32 %v1079_v22, %v228_v1 }
 0x4f4   :  { %v250_v24 = vmul.f32 %v1234_v20, %v244_v23 }
 0x4f5   :  { %v1081_v28 = vpop.eup %1080 }
 0x4f6   :  { %v245_v29 = vmul.f32 %v1081_v28, %v229_v5  ;;  %v256_v31 = vadd.f32 %v1239_v27, %v250_v24 }
 0x4f8   :  { %v251_v30 = vmul.f32 %v1234_v20, %v245_v29  ;;  %v258_v33 = vmax.f32 %v256_v31, 0.0 }
 0x4fa   :  { %v257_v32 = vadd.f32 %v1239_v27, %v251_v30 }
 0x4fc   :  { %v259_v34 = vmax.f32 %v257_v32, 0.0 }
 0x4fe   :  { %v264_v35 = vpack.c.bf16 %v259_v34, %v258_v33 }
 0x500   :  { %999 = vmatmul.mubr.msk.bf16.vlgmr.msra.gmra.mxu0 %vm218_vm4, %v264_v35 }
 0x501   :  { %1012 = vmatprep.mubr.msk.bf16.mxu0 %vm1115_vm1, %v1114_v0 }
 0x5c0   :  { %v314_v36 = vpop.f32.mrf.mxu0 }
 0x5c1   :  { %362 = vperm.xlu0 %1055, %v314_v36   ;;  %323 = vrot.lane.b32.xlu1 %v314_v36, %s1117_s0 }
 0x5c2   :  { %v1000_v37 = vpop.f32.mrf.mxu0 }
 0x5c4   :  { %v317_v38 = vpop.f32.mrf.mxu0 }
 0x5c5   :  { %325 = vrot.lane.b32.xlu1 %v317_v38, %s1117_s0  ;;  %v404_v39 = vpack.c.bf16 %v317_v38, %v314_v36 }
 0x5c6   :  { %v1001_v40 = vpop.f32.mrf.mxu0 }
 0x5c7   :  { %1003 = vmatpush3.bf16.msra.mxu1 %v404_v39  ;;  %v1058_v40 = vld [vmem:[%s1374_s4 + $0x18] sm:$0xff]  }
 0x5c8   :  { %1016 = vmatprep.subr.bf16.mxu1 %v1114_v0  ;;  %1009 = vmatpush3.bf16.msra.mxu0 %v1058_v40 }
 0x5c9   :  { %366 = vperm.xlu1 %1054, %v317_v38   ;;  %1010 = vmatprep.subr.bf16.mxu0 %v1114_v0 }
 0x633   :  { %v324_v41 = vpop.permute.xlu1 %323 }
 0x634   :  { %329 = vxpose.xlu1.b32.start [1/2] (short) (narrow) %v324_v41, 8  ;;  %v1059_v41 = vld [vmem:[%s1374_s4 + $0x10] sm:$0xff]  }
 0x635   :  { %1011 = vmatpush3.bf16.msra.mxu0 %v1059_v41 }
 0x636   :  { %1022 = vmatprep.subr.bf16.mxu0 %v1114_v0 }
 0x637   :  { %v326_v42 = vpop.permute.xlu1 %325 }
 0x638   :  { %330 = vxpose.xlu1.b32.end [2/2] (short) (narrow) %v326_v42, 8 }
 0x63c   :  { %v363_v46 = vpop.permute.xlu0 %362 }
 0x644   :  { %v367_v43 = vpop.permute.xlu1 %366 }
 0x6b0   :  { %v345_v44 = vpop.trf.xlu1 }
 0x6b1   :  { %v372_v45 = vrot.slane %v345_v44, %v1183_v17 }
 0x6b3   :  { %v373_v47 = vadd.f32 %v372_v45, %v363_v46  ;;  %v374_v48 = vadd.f32 %v372_v45, %v367_v43 }
 0x6b5   :  { %v375_v49 = vmul.f32 0.2, %v373_v47  ;;  %v376_v51 = vmul.f32 0.2, %v374_v48 }
 0x6b7   :  { %v378_v52 = vmax.f32 %v374_v48, %v376_v51  ;;  %v377_v53 = vmax.f32 %v373_v47, %v375_v49  ;;  %v483_v48 = vsub.s32 4, %v1180_v15  ;;  %v489_v51 = vsub.s32 5, %v1180_v15 }
 0x6b9   :  { %v380_v54 = vadd.f32 %v378_v52, %v1189_v25  ;;  %v379_v56 = vadd.f32 %v377_v53, %v1194_v26  ;;  %v484_v49 = vrot.slane %v1208_v50, %v483_v48 }
 0x6bb   :  { %v384_v57 = vsel %vm143_vm3, %v380_v54, -inf  ;;  %v381_v58 = vsel %vm143_vm3, %v379_v56, -inf }
 0x6bc   :  { %385 = vmax.xlane.f32.xlu1 %v384_v57  ;;  %382 = vmax.xlane.f32.xlu0 %v381_v58 }
 0x745   :  { %v386_v59 = vpop.xlane.xlu1 %385  ;;  %v383_v61 = vpop.xlane.xlu0 %382 }
 0x746   :  { %v388_v62 = vsub.f32 %v380_v54, %v386_v59  ;;  %v387_v63 = vsub.f32 %v379_v56, %v383_v61  ;;  %v490_v56 = vrot.slane %v1208_v50, %v489_v51 }
 0x748   :  { %v389_v1 = vmul.f32 1.442695, %v387_v63  ;;  %v391_v2 = vmul.f32 1.442695, %v388_v62 }
 0x74a   :  { %1082 = vpow2.f32 %v389_v1 }
 0x74b   :  { %1084 = vpow2.f32 %v391_v2 }
 0x757   :  { %v1083_v3 = vpop.eup %1082 }
 0x758   :  { %v393_v4 = vsel %vm143_vm3, %v1083_v3, 0.0  ;;  %v1085_v5 = vpop.eup %1084 }
 0x759   :  { %394 = vadd.xlane.f32.xlu0 %v393_v4  ;;  %v396_v6 = vsel %vm143_vm3, %v1085_v5, 0.0 }
 0x75d   :  { %397 = vadd.xlane.f32.xlu0 %v396_v6 }
 0x7e2   :  { %v395_v7 = vpop.xlane.xlu0 %394 }
 0x7e3   :  { %1086 = vrcp.f32 %v395_v7 }
 0x7e6   :  { %v398_v8 = vpop.xlane.xlu0 %397 }
 0x7e7   :  { %1088 = vrcp.f32 %v398_v8 }
 0x7f0   :  { %v1087_v9 = vpop.eup %1086 }
 0x7f1   :  { %v401_v11 = vmul.f32 %v1087_v9, %v1083_v3 }
 0x7f4   :  { %v1089_v10 = vpop.eup %1088 }
 0x7f5   :  { %v402_v12 = vmul.f32 %v1089_v10, %v1085_v5 }
 0x7f7   :  { %v403_v13 = vpack.c.bf16 %v402_v12, %v401_v11 }
 0x7f9   :  { %1005 = vmatmul.mubr.msk.bf16.vlgmr.msra.gmra.mxu1 %vm143_vm3, %v403_v13 }
 0x7fa   :  { %1018 = vmatprep.mubr.msk.bf16.mxu1 %vm1115_vm1, %v1114_v0 }
 0x8b9   :  { %v446_v18 = vpop.f32.mrf.mxu1 }
 0x8ba   :  { %v447_v19 = vadd.f32 %v446_v18, %v408_v16 }
 0x8bb   :  { %v1006_v21 = vpop.f32.mrf.mxu1 }
 0x8bc   :  { %v1263_v22 = vadd.f32 %v447_v19, %v1212_v55 }
 0x8bd   :  { %v449_v23 = vpop.f32.mrf.mxu1 }
 0x8be   :  { %v450_v24 = vadd.f32 %v449_v23, %v408_v16  ;;  %v455_v28 = vsel %vm218_vm4, %v1263_v22, 0.0 }
 0x8bf   :  { %456 = vadd.xlane.f32.xlu0 %v455_v28  ;;  %v1007_v29 = vpop.f32.mrf.mxu1 }
 0x8c0   :  { %v1268_v30 = vadd.f32 %v450_v24, %v1216_v60 }
 0x8c2   :  { %v458_v31 = vsel %vm218_vm4, %v1268_v30, 0.0 }
 0x8c3   :  { %459 = vadd.xlane.f32.xlu0 %v458_v31 }
 0x948   :  { %v457_v32 = vpop.xlane.xlu0 %456 }
 0x949   :  { %v461_v33 = vmul.f32 0.03125, %v457_v32 }
 0x94b   :  { %v463_v34 = vsub.f32 %v1263_v22, %v461_v33 }
 0x94c   :  { %v460_v55 = vpop.xlane.xlu0 %459 }
 0x94d   :  { %v462_v35 = vmul.f32 0.03125, %v460_v55  ;;  %v465_v36 = vmul.f32 %v463_v34, %v463_v34 }
 0x94f   :  { %v464_v37 = vsub.f32 %v1268_v30, %v462_v35  ;;  %v467_v38 = vsel %vm218_vm4, %v465_v36, 0.0 }
 0x950   :  { %468 = vadd.xlane.f32.xlu1 %v467_v38 }
 0x951   :  { %v466_v39 = vmul.f32 %v464_v37, %v464_v37 }
 0x953   :  { %v470_v60 = vsel %vm218_vm4, %v466_v39, 0.0 }
 0x954   :  { %471 = vadd.xlane.f32.xlu0 %v470_v60 }
 0x9d9   :  { %v469_v42 = vpop.xlane.xlu1 %468 }
 0x9da   :  { %v473_v43 = vmul.f32 0.03125, %v469_v42 }
 0x9dc   :  { %v475_v44 = vadd.f32 1e-05, %v473_v43 }
 0x9dd   :  { %v472_v45 = vpop.xlane.xlu0 %471 }
 0x9de   :  { %1090 = vrsqrt.f32 %v475_v44  ;;  %v474_v46 = vmul.f32 0.03125, %v472_v45  ;;  %v643_v44 = vsub.s32 6, %v1180_v15 }
 0x9e0   :  { %v476_v47 = vadd.f32 1e-05, %v474_v46  ;;  %v644_v45 = vrot.slane %v1208_v50, %v643_v44 }
 0x9e2   :  { %1092 = vrsqrt.f32 %v476_v47 }
 0x9eb   :  { %v1091_v52 = vpop.eup %1090 }
 0x9ec   :  { %v479_v53 = vmul.f32 %v1091_v52, %v463_v34 }
 0x9ee   :  { %v485_v54 = vmul.f32 %v484_v49, %v479_v53 }
 0x9ef   :  { %v1093_v57 = vpop.eup %1092 }
 0x9f0   :  { %v480_v58 = vmul.f32 %v1093_v57, %v464_v37  ;;  %v491_v61 = vadd.f32 %v490_v56, %v485_v54 }
 0x9f2   :  { %v486_v59 = vmul.f32 %v484_v49, %v480_v58  ;;  %v493_v63 = vmax.f32 %v491_v61, 0.0 }
 0x9f4   :  { %v492_v62 = vadd.f32 %v490_v56, %v486_v59 }
 0x9f6   :  { %v494_v1 = vmax.f32 %v492_v62, 0.0 }
 0x9f8   :  { %v500_v2 = vpack.c.bf16 %v494_v1, %v493_v63 }
 0x9fa   :  { %1013 = vmatmul.mubr.msk.bf16.vlgmr.msra.gmra.mxu0 %vm218_vm4, %v500_v2 }
 0x9fb   :  { %1026 = vmatprep.mubr.msk.bf16.mxu0 %vm1115_vm1, %v1114_v0 }
 0xaba   :  { %v550_v3 = vpop.f32.mrf.mxu0 }
 0xabb   :  { %559 = vrot.lane.b32.xlu1 %v550_v3, %s1117_s0 }
 0xabc   :  { %v1014_v4 = vpop.f32.mrf.mxu0 }
 0xabd   :  { %v1062_v4 = vld [vmem:[%s1376_s6 + $0x38] sm:$0xff]  }
 0xabe   :  { %v553_v5 = vpop.f32.mrf.mxu0 }
 0xabf   :  { %v640_v6 = vpack.c.bf16 %v553_v5, %v550_v3  ;;  %598 = vperm.xlu1 %1054, %v550_v3   ;;  %561 = vrot.lane.b32.xlu0 %v553_v5, %s1117_s0  ;;  %v1061_v3 = vld [vmem:[%s1375_s5] sm:$0xff]  }
 0xac0   :  { %v1015_v7 = vpop.f32.mrf.mxu0 }
 0xac1   :  { %1017 = vmatpush3.bf16.msra.mxu1 %v640_v6  ;;  %v1064_v6 = vld [vmem:[%s1376_s6 + $0x28] sm:$0xff]   ;;  %v1065_v7 = vld [vmem:[%s1376_s6 + $0x20] sm:$0xff]  }
 0xac2   :  { %1030 = vmatprep.subr.bf16.mxu1 %v1114_v0 }
 0xac3   :  { %602 = vperm.xlu1 %1054, %v553_v5   ;;  %v1063_v5 = vld [vmem:[%s1376_s6 + $0x30] sm:$0xff]  }
 0xb2d   :  { %v560_v8 = vpop.permute.xlu1 %559 }
 0xb2e   :  { %565 = vxpose.xlu0.b32.start [1/2] (short) (narrow) %v560_v8, 8  ;;  %v1066_v8 = vld [vmem:[%s1376_s6 + $0x18] sm:$0xff]  }
 0xb31   :  { %v562_v9 = vpop.permute.xlu0 %561 }
 0xb32   :  { %566 = vxpose.xlu0.b32.end [2/2] (short) (narrow) %v562_v9, 8 }
 0xb3a   :  { %v599_v10 = vpop.permute.xlu1 %598 }
 0xb3e   :  { %v603_v13 = vpop.permute.xlu1 %602 }
 0xbaa   :  { %v581_v11 = vpop.trf.xlu0 }
 0xbab   :  { %v608_v12 = vrot.slane %v581_v11, %v1183_v17 }
 0xbad   :  { %v609_v14 = vadd.f32 %v608_v12, %v599_v10  ;;  %v610_v16 = vadd.f32 %v608_v12, %v603_v13 }
 0xbaf   :  { %v611_v18 = vmul.f32 0.2, %v609_v14  ;;  %v612_v19 = vmul.f32 0.2, %v610_v16 }
 0xbb1   :  { %v614_v21 = vmax.f32 %v610_v16, %v612_v19  ;;  %v613_v23 = vmax.f32 %v609_v14, %v611_v18 }
 0xbb3   :  { %v616_v24 = vadd.f32 %v614_v21, %v1189_v25  ;;  %v615_v28 = vadd.f32 %v613_v23, %v1194_v26 }
 0xbb5   :  { %v620_v29 = vsel %vm143_vm3, %v616_v24, -inf  ;;  %v617_v31 = vsel %vm143_vm3, %v615_v28, -inf }
 0xbb6   :  { %621 = vmax.xlane.f32.xlu0 %v620_v29  ;;  %618 = vmax.xlane.f32.xlu1 %v617_v31 }
 0xc3f   :  { %v622_v32 = vpop.xlane.xlu0 %621  ;;  %v619_v33 = vpop.xlane.xlu1 %618 }
 0xc40   :  { %v624_v17 = vsub.f32 %v616_v24, %v622_v32  ;;  %v623_v34 = vsub.f32 %v615_v28, %v619_v33 }
 0xc42   :  { %v625_v55 = vmul.f32 1.442695, %v623_v34  ;;  %v627_v35 = vmul.f32 1.442695, %v624_v17  ;;  %v1067_v17 = vld [vmem:[%s1376_s6 + $0x10] sm:$0xff]  }
 0xc43   :  { %v955_v34 = vld [vmem:[%s1375_s5 + $0x10] sm:$0xff]  }
 0xc44   :  { %1094 = vpow2.f32 %v625_v55 }
 0xc45   :  { %1096 = vpow2.f32 %v627_v35 }
 0xc51   :  { %v1095_v36 = vpop.eup %1094 }
 0xc52   :  { %v629_v37 = vsel %vm143_vm3, %v1095_v36, 0.0  ;;  %v1097_v25 = vpop.eup %1096 }
 0xc53   :  { %630 = vadd.xlane.f32.xlu1 %v629_v37  ;;  %v632_v26 = vsel %vm143_vm3, %v1097_v25, 0.0 }
 0xc57   :  { %633 = vadd.xlane.f32.xlu1 %v632_v26 }
 0xcdc   :  { %v631_v38 = vpop.xlane.xlu1 %630 }
 0xcdd   :  { %1098 = vrcp.f32 %v631_v38 }
 0xce0   :  { %v634_v39 = vpop.xlane.xlu1 %633 }
 0xce1   :  { %1100 = vrcp.f32 %v634_v39 }
 0xcea   :  { %v1099_v60 = vpop.eup %1098 }
 0xceb   :  { %v637_v41 = vmul.f32 %v1099_v60, %v1095_v36  ;;  %v953_v36 = vunpack.c.l.bf16 %v955_v34 }
 0xcee   :  { %v1101_v40 = vpop.eup %1100 }
 0xcef   :  { %v638_v42 = vmul.f32 %v1101_v40, %v1097_v25  ;;  %v954_v25 = vunpack.c.h.bf16 %v955_v34 }
 0xcf1   :  { %v639_v43 = vpack.c.bf16 %v638_v42, %v637_v41 }
 0xcf3   :  { %1019 = vmatmul.mubr.msk.bf16.vlgmr.msra.gmra.mxu1 %vm143_vm3, %v639_v43 }
 0xcf4   :  { %1046 = vmatprep.mubr.msk.bf16.mxu1 %vm1115_vm1, %v1114_v0  ;;  %1031 = vmatpush3.bf16.msra.mxu1 %v1062_v4 }
 0xcf5   :  { %1032 = vmatprep.subr.bf16.mxu1 %v1114_v0 }
 0xcf8   :  { %1033 = vmatpush3.bf16.msra.mxu1 %v1063_v5 }
 0xcf9   :  { %1034 = vmatprep.subr.bf16.mxu1 %v1114_v0 }
 0xcfc   :  { %1035 = vmatpush3.bf16.msra.mxu1 %v1064_v6 }
 0xcfd   :  { %1036 = vmatprep.subr.bf16.mxu1 %v1114_v0 }
 0xd00   :  { %1037 = vmatpush3.bf16.msra.mxu1 %v1065_v7 }
 0xd01   :  { %1038 = vmatprep.subr.bf16.mxu1 %v1114_v0 }
 0xd04   :  { %1039 = vmatpush3.bf16.msra.mxu1 %v1066_v8 }
 0xd05   :  { %1040 = vmatprep.subr.bf16.mxu1 %v1114_v0 }
 0xd08   :  { %1041 = vmatpush3.bf16.msra.mxu1 %v1067_v17 }
 0xd09   :  { %1042 = vmatprep.subr.bf16.mxu1 %v1114_v0 }
 0xdb3   :  { %v682_v46 = vpop.f32.mrf.mxu1 }
 0xdb4   :  { %v683_v47 = vadd.f32 %v682_v46, %v644_v45 }
 0xdb5   :  { %v1020_v48 = vpop.f32.mrf.mxu1 }
 0xdb6   :  { %v689_v49 = vadd.f32 %v683_v47, %v1263_v22 }
 0xdb7   :  { %v685_v51 = vpop.f32.mrf.mxu1 }
 0xdb8   :  { %v686_v52 = vadd.f32 %v685_v51, %v644_v45  ;;  %v691_v53 = vsel %vm218_vm4, %v689_v49, 0.0 }
 0xdb9   :  { %692 = vadd.xlane.f32.xlu1 %v691_v53  ;;  %v1021_v54 = vpop.f32.mrf.mxu1 }
 0xdba   :  { %v690_v56 = vadd.f32 %v686_v52, %v1268_v30  ;;  %v1060_v30 = vld [vmem:[%s1375_s5 + $0x8] sm:$0xff]  }
 0xdbb   :  { %1023 = vmatpush3.bf16.msra.mxu0 %v1060_v30 }
 0xdbc   :  { %v694_v57 = vsel %vm218_vm4, %v690_v56, 0.0  ;;  %1024 = vmatprep.subr.bf16.mxu0 %v1114_v0 }
 0xdbd   :  { %695 = vadd.xlane.f32.xlu1 %v694_v57 }
 0xdbf   :  { %1025 = vmatpush3.bf16.msra.mxu0 %v1061_v3 }
 0xe42   :  { %v693_v58 = vpop.xlane.xlu1 %692 }
 0xe43   :  { %v697_v15 = vmul.f32 0.03125, %v693_v58 }
 0xe45   :  { %v699_v59 = vsub.f32 %v689_v49, %v697_v15 }
 0xe46   :  { %v696_v50 = vpop.xlane.xlu1 %695 }
 0xe47   :  { %v698_v61 = vmul.f32 0.03125, %v696_v50  ;;  %v701_v62 = vmul.f32 %v699_v59, %v699_v59 }
 0xe49   :  { %v700_v63 = vsub.f32 %v690_v56, %v698_v61  ;;  %v703_v22 = vsel %vm218_vm4, %v701_v62, 0.0 }
 0xe4a   :  { %704 = vadd.xlane.f32.xlu1 %v703_v22 }
 0xe4b   :  { %v702_v1 = vmul.f32 %v700_v63, %v700_v63 }
 0xe4d   :  { %v706_v2 = vsel %vm218_vm4, %v702_v1, 0.0 }
 0xe4e   :  { %707 = vadd.xlane.f32.xlu1 %v706_v2 }
 0xed3   :  { %v705_v9 = vpop.xlane.xlu1 %704 }
 0xed4   :  { %v709_v10 = vmul.f32 0.03125, %v705_v9 }
 0xed6   :  { %v711_v11 = vadd.f32 1e-05, %v709_v10 }
 0xed7   :  { %v708_v12 = vpop.xlane.xlu1 %707 }
 0xed8   :  { %1102 = vrsqrt.f32 %v711_v11  ;;  %v710_v13 = vmul.f32 0.03125, %v708_v12 }
 0xeda   :  { %v712_v14 = vadd.f32 1e-05, %v710_v13 }
 0xedc   :  { %1104 = vrsqrt.f32 %v712_v14 }
 0xee5   :  { %v1103_v16 = vpop.eup %1102 }
 0xee6   :  { %v715_v18 = vmul.f32 %v1103_v16, %v699_v59 }
 0xee8   :  { %v717_v19 = vmul.f32 %v715_v18, %v1234_v20 }
 0xee9   :  { %v1105_v21 = vpop.eup %1104 }
 0xeea   :  { %v716_v23 = vmul.f32 %v1105_v21, %v700_v63  ;;  %v719_v28 = vadd.f32 %v717_v19, %v1239_v27 }
 0xeec   :  { %v718_v24 = vmul.f32 %v716_v23, %v1234_v20  ;;  %v721_v31 = vmax.f32 %v719_v28, 0.0  ;;  %v1068_v20 = vld [vmem:[%s1376_s6 + $0x8] sm:$0xff]  }
 0xeed   :  { %1043 = vmatpush3.bf16.msra.mxu1 %v1068_v20 }
 0xeee   :  { %v720_v29 = vadd.f32 %v718_v24, %v1239_v27  ;;  %1044 = vmatprep.subr.bf16.mxu1 %v1114_v0  ;;  %v1069_v27 = vld [vmem:[%s1376_s6] sm:$0xff]  }
 0xef0   :  { %v722_v32 = vmax.f32 %v720_v29, 0.0 }
 0xef1   :  { %1045 = vmatpush3.bf16.msra.mxu1 %v1069_v27 }
 0xef2   :  { %v731_v33 = vpack.c.bf16 %v722_v32, %v721_v31 }
 0xef4   :  { %1027 = vmatmul.mubr.msk.bf16.vlgmr.msra.gmra.mxu0 %vm218_vm4, %v731_v33 }
 0xfb4   :  { %v781_v55 = vpop.f32.mrf.mxu0 }
 0xfb5   :  { %v788_v37 = vmax.f32 %v781_v55, 0.0 }
 0xfb6   :  { %v1028_v35 = vpop.f32.mrf.mxu0 }
 0xfb7   :  { %v790_v60 = vmul.f32 %v953_v36, %v788_v37 }
 0xfb8   :  { %v784_v26 = vpop.f32.mrf.mxu0 }
 0xfb9   :  { %v789_v38 = vmax.f32 %v784_v26, 0.0 }
 0xfba   :  { %v1029_v39 = vpop.f32.mrf.mxu0 }
 0xfbb   :  { %v791_v40 = vmul.f32 %v954_v25, %v789_v38 }
 0xfbd   :  { %v792_v0 = vpack.c.bf16 %v791_v40, %v790_v60 }
 0xfbf   :  { %1047 = vmatmul.mubr.bf16.vlgmr.msra.gmra.mxu1 %v792_v0 }
0x107f   :  { %v891_v41 = vpop.f32.mrf.mxu1 }
0x1080   :  { %v898_v42 = vsel %vm34_vm2, %v891_v41, -inf }
0x1081   :  { %899 = vmax.xlane.f32.xlu1 %v898_v42  ;;  %v1048_v43 = vpop.f32.mrf.mxu1 }
0x1083   :  { %v894_v44 = vpop.f32.mrf.mxu1 }
0x1084   :  { %v901_v45 = vsel %vm34_vm2, %v894_v44, -inf }
0x1085   :  { %902 = vmax.xlane.f32.xlu1 %v901_v45  ;;  %v1049_v46 = vpop.f32.mrf.mxu1 }
0x110a   :  { %v900_v47 = vpop.xlane.xlu1 %899 }
0x110b   :  { %v904_v48 = vsub.f32 %v891_v41, %v900_v47 }
0x110d   :  { %v906_v49 = vmul.f32 1.442695, %v904_v48 }
0x110e   :  { %v903_v51 = vpop.xlane.xlu1 %902 }
0x110f   :  { %1106 = vpow2.f32 %v906_v49  ;;  %v905_v52 = vsub.f32 %v894_v44, %v903_v51 }
0x1111   :  { %v908_v53 = vmul.f32 1.442695, %v905_v52 }
0x1113   :  { %1108 = vpow2.f32 %v908_v53 }
0x111c   :  { %v1107_v54 = vpop.eup %1106 }
0x111d   :  { %v910_v56 = vsel %vm34_vm2, %v1107_v54, 0.0 }
0x111e   :  { %911 = vadd.xlane.f32.xlu1 %v910_v56 }
0x1120   :  { %v1109_v57 = vpop.eup %1108 }
0x1121   :  { %v913_v58 = vsel %vm34_vm2, %v1109_v57, 0.0 }
0x1122   :  { %914 = vadd.xlane.f32.xlu1 %v913_v58 }
0x11a7   :  { %v912_v15 = vpop.xlane.xlu1 %911 }
0x11a8   :  { %1110 = vrcp.f32 %v912_v15 }
0x11ab   :  { %v915_v59 = vpop.xlane.xlu1 %914 }
0x11ac   :  { %1112 = vrcp.f32 %v915_v59 }
0x11b5   :  { %v1111_v50 = vpop.eup %1110 }
0x11b6   :  { %v917_v61 = vmul.f32 %v1111_v50, %v1107_v54 }
0x11b8   :  { %920 = vst.msk [vmem:[%s1377_s7] sm:$0xff] %vm34_vm2, %v917_v61 }
0x11b9   :  { %v1113_v62 = vpop.eup %1112 }
0x11ba   :  { %v919_v63 = vmul.f32 %v1113_v62, %v1109_v57 }
0x11bc   :  { %921 = vst.msk [vmem:[%s1377_s7 + $0x8] sm:$0xff] %vm34_vm2, %v919_v63 }

</bundles_post_ra>
